<compile_context>
chip_gen: v6e
topology: v6e:2x2x1
jax: 0.10.0
libtpu: 0.0.40
codegen_flags: <defaults>
</compile_context>

<pallas_src>
import math
import functools

import jax
import jax.numpy as jnp
from jax.experimental import pallas as pl
from jax.experimental.pallas import tpu as pltpu


def _pe_kernel(seed_ref, x_ref, pe_ref, o_ref, *, p, training):
    # (TS, TN) tile + (1, TN) positional row (sublane broadcast) -- pure VPU add.
    y = x_ref[...] + pe_ref[...]
    if training and p > 0.0:
        # Per-tile seed so each grid step draws an independent dropout mask
        # (required for correctness when the grid is sharded across cores).
        pltpu.prng_seed(seed_ref[0], pl.program_id(0), pl.program_id(1))
        bits = pltpu.bitcast(pltpu.prng_random_bits(y.shape), jnp.uint32)
        # Drop with probability p: compare raw uint32 bits against an integer
        # threshold (no shift / int->float convert / float compare needed).
        thresh = jnp.uint32(min(int(p * (1 << 32)), (1 << 32) - 1))
        keep = bits >= thresh
        y32 = y.astype(jnp.float32)
        y = jnp.where(keep, y32 * jnp.float32(1.0 / (1.0 - p)),
                      jnp.zeros_like(y32))
    o_ref[...] = y.astype(o_ref.dtype)


def make_positional_encoding_table(d_model: int, max_len: int = 5000) -> jnp.ndarray:
    """Deterministic buffer init mirroring the module's __init__ (plain JAX glue).

    Assumes even d_model (same latent constraint as the PyTorch reference).
    """
    position = jnp.arange(max_len, dtype=jnp.float32)[:, None]               # (max_len, 1)
    div_term = jnp.exp(
        jnp.arange(0, d_model, 2, dtype=jnp.float32) * (-math.log(10000.0) / d_model)
    )                                                                         # (d_model//2,)
    angles = position * div_term                                              # (max_len, d_model//2)
    pe = jnp.zeros((max_len, d_model), dtype=jnp.float32)
    pe = pe.at[:, 0::2].set(jnp.sin(angles))
    pe = pe.at[:, 1::2].set(jnp.cos(angles))
    return pe


def _choose_tiles(S: int, N: int, itemsize: int,
                  *, target_tile_bytes: int = 8 << 20, min_grid_steps: int = 8):
    """Pick (TS, TN) for the flattened (S, N) layout.

    * TN is a multiple of 128 (or the full N) so stores stay lane-dense.
    * TS is a multiple of the sublane packing factor (8 for f32, 16 for bf16).
    * Per-tile footprint <= target_tile_bytes, so double-buffered in+out blocks
      stay ~4x that (well under the explicit 48 MiB VMEM limit on every chip,
      including v7x's 64 MiB physical VMEM).
    * For large tensors, tiles are shrunk until there are >= min_grid_steps
      grid steps, so both TensorCores on megacore parts get work and the DMA
      pipeline has something to overlap.
    """
    LANE = 128
    sub = 8 if itemsize >= 4 else (16 if itemsize == 2 else 32)

    # Lane (last-dim) tile: prefer the full row; only split very wide rows.
    max_tn = max(LANE, ((target_tile_bytes // (sub * itemsize)) // LANE) * LANE)
    TN = N if N <= max(LANE, max_tn) else max_tn
    if N < LANE:
        TN = N                       # narrow row: must take the full dim

    # Sublane (row) tile from the remaining byte budget.
    rows = max(1, target_tile_bytes // (TN * itemsize))
    if rows >= S and TN == N:
        TS = S                       # whole array in one block
    else:
        TS = max(sub, (rows // sub) * sub)

    # Megacore / pipeline hygiene: only bother splitting further when the
    # tensor is big enough that extra grid steps are worth their ~0.35us each.
    total_bytes = S * N * itemsize
    if total_bytes >= min_grid_steps * (1 << 20):
        def n_steps(ts, tn):
            return pl.cdiv(S, ts) * pl.cdiv(N, tn)
        while n_steps(TS, TN) < min_grid_steps:
            if TS > sub:
                TS = max(sub, ((TS // 2) // sub) * sub)
            elif TN > LANE:
                TN = max(LANE, ((TN // 2) // LANE) * LANE)
            else:
                break
    return TS, TN


def positional_encoding_forward(x, pe, *, p: float = 0.1, training: bool = False, seed: int = 0):
    """x: [seq_len, batch, d_model] (f32 or bf16).  Returns same shape/dtype."""
    S, B, D = x.shape
    N = B * D

    # Reproduce torch's right-aligned broadcast: out[s,b,d] = x[s,b,d] + pe[:S][b,d].
    # broadcast_to raises for invalid shapes exactly where torch would.
    # The row is tiny (B*D elements); flattening it keeps the kernel lane-dense.
    pe_row = jnp.broadcast_to(pe[:S], (B, D)).reshape(1, N).astype(x.dtype)

    # Free, zero-copy reshape to a lane-dense layout (last dim = B*D).
    x_flat = x.reshape(S, N)

    itemsize = jnp.dtype(x.dtype).itemsize
    TS, TN = _choose_tiles(S, N, itemsize)
    grid = (pl.cdiv(S, TS), pl.cdiv(N, TN))

    kernel = functools.partial(_pe_kernel, p=float(p), training=bool(training))
    seed_arr = jnp.asarray([seed], dtype=jnp.int32)

    out_flat = pl.pallas_call(
        kernel,
        out_shape=jax.ShapeDtypeStruct((S, N), x.dtype),
        grid_spec=pltpu.PrefetchScalarGridSpec(
            num_scalar_prefetch=1,                               # seed lands in SMEM
            grid=grid,
            in_specs=[
                pl.BlockSpec((TS, TN), lambda i, j, seed: (i, j)),   # streamed x tiles
                pl.BlockSpec((1, TN), lambda i, j, seed: (0, j)),    # pe row slice
            ],
            out_specs=pl.BlockSpec((TS, TN), lambda i, j, seed: (i, j)),
        ),
        compiler_params=pltpu.CompilerParams(
            # Both axes are independent -> shardable across TensorCores.
            # (pltpu.CORE_PARALLEL is a possible further win on v7x but is not
            #  portable to single-TC chips, so we keep the safe default here.)
            dimension_semantics=("parallel", "parallel"),
            # Explicit limit: v5e's scoped default is only 16 MiB; 48 MiB keeps
            # the 8 MiB double-buffered tiles pipelined and still fits v7x's
            # 64 MiB physical VMEM with headroom.
            vmem_limit_bytes=48 << 20,
        ),
    )(seed_arr, x_flat, pe_row)

    return out_flat.reshape(S, B, D)


if __name__ == "__main__":
    d_model = 32
    seq_len = 8
    batch = 8      # reference broadcast requires batch == seq_len (or seq_len == 1)

    key = jax.random.PRNGKey(0)
    x = jax.random.normal(key, (seq_len, batch, d_model), dtype=jnp.float32)

    pe = make_positional_encoding_table(d_model, max_len=5000)

    # Eval mode (dropout is identity) -- must match the reference exactly.
    out = jax.block_until_ready(positional_encoding_forward(x, pe, p=0.1, training=False))
    ref = x + pe[:seq_len]
    assert out.shape == x.shape and out.dtype == x.dtype
    assert jnp.allclose(out, ref, atol=1e-6, rtol=1e-6)

    # bf16 path (halves HBM traffic; the kernel is purely bandwidth-bound).
    x_bf = x.astype(jnp.bfloat16)
    out_bf = jax.block_until_ready(positional_encoding_forward(x_bf, pe, p=0.1, training=False))
    ref_bf = x_bf + pe[:seq_len].astype(jnp.bfloat16)
    assert out_bf.shape == x_bf.shape and out_bf.dtype == jnp.bfloat16
    assert jnp.allclose(out_bf.astype(jnp.float32), ref_bf.astype(jnp.float32),
                        atol=1e-2, rtol=1e-2)

    # Training mode uses the TPU hardware PRNG (pltpu.prng_seed / prng_random_bits),
    # which has no CPU/interpret lowering -- only exercise it on a real TPU backend.
    # TODO(synk): dropout mask uses the TPU hardware PRNG and cannot bit-match torch's RNG stream.
    if jax.default_backend() == "tpu":
        p_drop = 0.5
        out_tr = jax.block_until_ready(
            positional_encoding_forward(x, pe, p=p_drop, training=True, seed=123)
        )
        assert out_tr.shape == x.shape and out_tr.dtype == x.dtype
        scale = 1.0 / (1.0 - p_drop)
        ok = jnp.isclose(out_tr, 0.0, atol=1e-6) | jnp.isclose(out_tr, ref * scale, atol=1e-5)
        assert bool(jnp.all(ok))

    print("KERNEL_OK")
</pallas_src>

<mosaic_0001>
module attributes {stable_mosaic.version = 11 : i64} {
  func.func @_pe_kernel(%arg0: i32, %arg1: i32, %arg2: memref<1xi32, #tpu.memory_space<smem>>, %arg3: memref<8x256xf32, #tpu.memory_space<vmem>>, %arg4: memref<1x256xf32, #tpu.memory_space<vmem>>, %arg5: memref<8x256xf32, #tpu.memory_space<vmem>>) attributes {dimension_semantics = [#tpu.dimension_semantics<parallel>, #tpu.dimension_semantics<parallel>], iteration_bounds = array<i64: 1, 1>, scalar_prefetch = 1 : i64, scratch_operands = 0 : i64, tpu.core_type = #tpu.core_type<tc>, window_params = [{transform_indices = @transform_0, window_bounds = array<i64: 8, 256>}, {transform_indices = @transform_1, window_bounds = array<i64: 1, 256>}, {transform_indices = @transform_2, window_bounds = array<i64: 8, 256>}]} {
    %c0 = arith.constant 0 : index
    %c0_0 = arith.constant 0 : index
    %0 = vector.load %arg3[%c0, %c0_0] : memref<8x256xf32, #tpu.memory_space<vmem>>, vector<8x256xf32>
    %c0_1 = arith.constant 0 : index
    %c0_2 = arith.constant 0 : index
    %1 = vector.load %arg4[%c0_1, %c0_2] : memref<1x256xf32, #tpu.memory_space<vmem>>, vector<1x256xf32>
    %2 = vector.broadcast %1 : vector<1x256xf32> to vector<8x256xf32>
    %3 = arith.addf %0, %2 : vector<8x256xf32>
    %c0_3 = arith.constant 0 : index
    %c0_4 = arith.constant 0 : index
    %4 = vector.load %arg5[%c0_3, %c0_4] : memref<8x256xf32, #tpu.memory_space<vmem>>, vector<8x256xf32>
    tpu.vector_store %arg5[%c0_3, %c0_4], %3 {strides = array<i32>} : memref<8x256xf32, #tpu.memory_space<vmem>>, vector<8x256xf32>,
    return
  }
  func.func @transform_0(%arg0: i32, %arg1: i32, %arg2: memref<1xi32, #tpu.memory_space<smem>>) -> (i32, i32) {
    %c0_i32 = arith.constant 0 : i32
    return %arg0, %arg1 : i32, i32
  }
  func.func @transform_1(%arg0: i32, %arg1: i32, %arg2: memref<1xi32, #tpu.memory_space<smem>>) -> (i32, i32) {
    %c0_i32 = arith.constant 0 : i32
    %c0_i32_0 = arith.constant 0 : i32
    return %c0_i32, %arg1 : i32, i32
  }
  func.func @transform_2(%arg0: i32, %arg1: i32, %arg2: memref<1xi32, #tpu.memory_space<smem>>) -> (i32, i32) {
    %c0_i32 = arith.constant 0 : i32
    return %arg0, %arg1 : i32, i32
  }
}

</mosaic_0001>

<bundles_post_ra>
// kernel: tpu_custom_call.1
= control target key start
LH: loop header
LB: loop body
LE: loop exit
PB: predicated region body
PF: predicated region fallthrough
CT: control target
= control target key end

     0   :  { %9 = vsyncpa [#allocation5], 0  ;;  %s136_s0 = inlined_call_operand.<no memory space> [shape: s32[1], index: 0, kind: input, shape index: {}]   ;;  %s137_s1 = inlined_call_operand.hbm [shape: f32[8,256], index: 1, kind: input, shape index: {}]   ;;  %s138_s2 = inlined_call_operand.vmem [shape: f32[1,256], index: 2, kind: input, shape index: {}]   ;;  %s139_s3 = inlined_call_operand.hbm [shape: f32[8,256], index: 3, kind: output, shape index: {}]  }
   0x1   :  { %10 = vsyncpa [#allocation6], 0  ;;  %s105_s12 = smov [#allocation4]  }
   0x2   :  { %s17_s13 = sshll.u32 %s105_s12, 4  ;;  %s18_s13 = int_to_ptr.vmem [resolvable:$true] %s17_s13 }
   0x3   :  { %s69_s14 = scalar_lea.vmem %s18_s13, 256  ;;  %p74_p1 = scmp.lt.s32.totalorder %s18_s13, %s18_s13 }
   0x4   :  { %p70_p0 = scmp.ne.s32.totalorder %s18_s13, %s69_s14  ;;  %p75_p2 = scmp.lt.s32.totalorder %s69_s14, %s69_s14 }
   0x6   :  { %p76_p3 = por %p75_p2, %p74_p1 }
   0x8   :  { %p77_p4 = pnand %p76_p3, %p70_p0 }
   0xa   :  { %80 = shalt.err (!%p77_p4)
}
   0xb   :  { %20 = dma.hbm_to_vmem [thread:$0]  %s137_s1, 256, %s18_s13, [#allocation5]  }
   0xc   :  { %101 = dma.done.wait [#allocation5], 256  }
   0xd   :  { %102 = vsyncadd [#allocation5], 4294967040  ;;  %v30_v0 = vlaneseq  ;;  %v26_v4 = vld [vmem:[#allocation4] sm:$0xff]  ;;  %v27_v6 = vld [vmem:[#allocation4 + $0x8] sm:$0xff]  ;;  %s106_s18 = smov [#allocation7]  }
   0xe   :  { %v28_v5 = vld [vmem:[%s138_s2] sm:$0x3]  ;;  %s50_s19 = sshll.u32 %s106_s18, 4  ;;  %s51_s19 = int_to_ptr.vmem [resolvable:$true] %s50_s19 }
   0xf   :  { %v31_v1 = vshrl.u32 %v30_v0, 7  ;;  %s81_s1 = scalar_lea.vmem %s51_s19, 256  ;;  %p86_p6 = scmp.lt.s32.totalorder %s51_s19, %s51_s19 }
  0x10   :  { %p82_p5 = scmp.ne.s32.totalorder %s51_s19, %s81_s1  ;;  %p87_p7 = scmp.lt.s32.totalorder %s81_s1, %s81_s1 }
  0x11   :  { %v32_v2 = vsub.s32 0, %v31_v1  ;;  %v36_v3 = vsub.s32 1, %v31_v1 }
  0x12   :  { %p88_p8 = por %p87_p7, %p86_p6 }
  0x13   :  { %v33_v7 = vrot.slane %v28_v5, %v32_v2  ;;  %v37_v8 = vrot.slane %v28_v5, %v36_v3 }
  0x14   :  { %p89_p9 = pnand %p88_p8, %p82_p5 }
  0x15   :  { %v40_v9 = vadd.f32 %v33_v7, %v26_v4  ;;  %v41_v10 = vadd.f32 %v37_v8, %v27_v6 }
  0x17   :  { %42 = vst [vmem:[#allocation7] sm:$0xff] %v40_v9  ;;  %43 = vst [vmem:[#allocation7 + $0x8] sm:$0xff] %v41_v10 }
  0x18   :  { %92 = shalt.err (!%p89_p9)
}
  0x19   :  { %53 = dma.vmem_to_hbm [thread:$0]  %s51_s19, 256, %s139_s3, [#allocation6]  }
  0x1a   :  { %103 = dma.done.wait [#allocation6], 256  }
  0x1b   :  { %104 = vsyncadd [#allocation6], 4294967040 }
  0x1c   :  { %57 = vsyncpa [#allocation5], 1 }
  0x1d   :  { %58 = vsyncpa [#allocation6], 1 }

</bundles_post_ra>
